<compile_context>
chip_gen: v7x
topology: tpu7x:2x2x1
jax: 0.10.0
libtpu: 0.0.40
codegen_flags: <defaults>
</compile_context>

<pallas_src>
import math

import jax
import jax.numpy as jnp
from jax import lax
from jax.experimental import pallas as pl
from jax.experimental.pallas import tpu as pltpu

TM_MAX = 2048        # max sublane tile height per grid step (1 MiB f32 tile)
TM_MIN = 256         # per-step floor so small inputs don't pay per-step overhead
LANES = 128          # lane tile
SUB = 8              # minimum sublane granularity
TARGET_STEPS = 8     # aim for >= this many grid steps (feed both v7x TCs)


def flow1d_kernel(mus_ref, erf_scale_ref, pdf_scale_ref, half_w_ref,
                  x_ref, z_ref, dz_ref):
    # mus/erf_scale/pdf_scale/half_w are scalar-prefetched (K,) SMEM refs.
    x = x_ref[...]                               # (tm, LANES) f32
    # softmax weights sum to 1, so sum_k 0.5*w_k == 0.5 -> folded into init.
    z = jnp.full_like(x, 0.5)
    dz = jnp.zeros_like(x)
    n_comp = mus_ref.shape[0]
    for k in range(n_comp):                      # K is small and static
        mu = mus_ref[k]
        es = erf_scale_ref[k]                    # exp(-log_sigma) / sqrt(2)
        ps = pdf_scale_ref[k]                    # w * exp(-log_sigma) / sqrt(2*pi)
        hw = half_w_ref[k]                       # 0.5 * w
        s = (x - mu) * es
        z = z + lax.erf(s) * hw
        dz = dz + jnp.exp(-(s * s)) * ps
    z_ref[...] = z
    dz_ref[...] = dz


def _fold_params(mus, log_sigmas, weight_logits):
    mus_f = mus.astype(jnp.float32)
    log_sigmas_f = log_sigmas.astype(jnp.float32)
    weights = jax.nn.softmax(weight_logits.astype(jnp.float32))
    inv_sigma = jnp.exp(-log_sigmas_f)
    erf_scale = inv_sigma * jnp.float32(1.0 / math.sqrt(2.0))
    pdf_scale = weights * inv_sigma * jnp.float32(1.0 / math.sqrt(2.0 * math.pi))
    half_w = jnp.float32(0.5) * weights
    return mus_f, erf_scale, pdf_scale, half_w


def _mixture_eval_jax(xf, mus_f, erf_scale, pdf_scale, half_w):
    """Plain-JAX evaluation for small / tail segments.  xf: (m,) f32."""
    s = (xf[:, None] - mus_f[None, :]) * erf_scale[None, :]
    z = 0.5 + (lax.erf(s) * half_w[None, :]).sum(axis=1)
    dz = (jnp.exp(-(s * s)) * pdf_scale[None, :]).sum(axis=1)
    return z, dz


def _pick_tile_rows(rows):
    """Choose tm (multiple of 8): target >=TARGET_STEPS steps, floor TM_MIN rows."""
    tm_target = pl.cdiv(rows, TARGET_STEPS)
    tm_target = ((tm_target + SUB - 1) // SUB) * SUB
    tm = max(min(rows, TM_MIN), tm_target)
    tm = min(tm, TM_MAX, rows)
    return tm


def flow1d_forward(x, mus, log_sigmas, weight_logits):
    """Returns (z, dz_by_dx), each of shape (x.size,), matching the torch module."""
    x_flat = x.reshape(-1)
    if x_flat.dtype != jnp.float32:
        x_flat = x_flat.astype(jnp.float32)
    n = x_flat.shape[0]

    mus_f, erf_scale, pdf_scale, half_w = _fold_params(mus, log_sigmas, weight_logits)

    block = SUB * LANES                 # 1024-element alignment unit
    n_main = (n // block) * block       # aligned prefix handled by the kernel

    if n_main == 0:
        # Tiny input: not worth a kernel launch; pure JAX.
        return _mixture_eval_jax(x_flat, mus_f, erf_scale, pdf_scale, half_w)

    rows = n_main // LANES              # multiple of 8
    x2d = x_flat[:n_main].reshape(rows, LANES)

    tm = _pick_tile_rows(rows)
    grid = pl.cdiv(rows, tm)

    z2d, dz2d = pl.pallas_call(
        flow1d_kernel,
        out_shape=(jax.ShapeDtypeStruct((rows, LANES), jnp.float32),
                   jax.ShapeDtypeStruct((rows, LANES), jnp.float32)),
        grid_spec=pltpu.PrefetchScalarGridSpec(
            num_scalar_prefetch=4,      # mus, erf_scale, pdf_scale, half_w -> SMEM once
            grid=(grid,),
            in_specs=[
                pl.BlockSpec((tm, LANES), lambda i, *_: (i, 0)),    # x tile
            ],
            out_specs=[
                pl.BlockSpec((tm, LANES), lambda i, *_: (i, 0)),    # z tile
                pl.BlockSpec((tm, LANES), lambda i, *_: (i, 0)),    # dz tile
            ],
        ),
        compiler_params=pltpu.CompilerParams(
            dimension_semantics=("parallel",)),
    )(mus_f, erf_scale, pdf_scale, half_w, x2d)

    z_main = z2d.reshape(-1)
    dz_main = dz2d.reshape(-1)

    if n_main == n:
        return z_main, dz_main

    # Ragged tail (< 1024 elements): compute in plain JAX, no pad / no slice copies.
    z_tail, dz_tail = _mixture_eval_jax(x_flat[n_main:], mus_f, erf_scale,
                                        pdf_scale, half_w)
    return (jnp.concatenate([z_main, z_tail]),
            jnp.concatenate([dz_main, dz_tail]))


def flow1d_reference(x, mus, log_sigmas, weight_logits):
    """Pure-JAX reference mirroring the PyTorch forward."""
    xf = x.reshape(-1, 1).astype(jnp.float32)
    w = jax.nn.softmax(weight_logits.astype(jnp.float32)).reshape(1, -1)
    sigma = jnp.exp(log_sigmas).reshape(1, -1)
    mu = mus.reshape(1, -1)
    u = (xf - mu) / sigma
    cdf = 0.5 * (1.0 + lax.erf(u / jnp.sqrt(2.0)))
    pdf = jnp.exp(-0.5 * u * u) / (sigma * jnp.sqrt(2.0 * jnp.pi))
    z = (cdf * w).sum(axis=1)
    dz = (pdf * w).sum(axis=1)
    return z, dz


if __name__ == "__main__":
    key = jax.random.PRNGKey(0)
    k_mus, k_x = jax.random.split(key)

    n_components = 4
    # Deterministic parameter init mirroring the module's __init__ shapes:
    #   mus ~ randn(K), log_sigmas = zeros(K), weight_logits = ones(K)
    mus = jax.random.normal(k_mus, (n_components,), dtype=jnp.float32)
    log_sigmas = jnp.zeros((n_components,), dtype=jnp.float32)
    weight_logits = jnp.ones((n_components,), dtype=jnp.float32)

    # Small NCHW-ish input; forward flattens it anyway (x.view(-1, 1)).
    x = jax.random.normal(k_x, (2, 4, 16, 16), dtype=jnp.float32)

    z, dz = flow1d_forward(x, mus, log_sigmas, weight_logits)
    jax.block_until_ready((z, dz))

    z_ref, dz_ref = flow1d_reference(x, mus, log_sigmas, weight_logits)
    assert z.shape == (x.size,) and dz.shape == (x.size,)
    assert jnp.allclose(z, z_ref, atol=1e-5, rtol=1e-5)
    assert jnp.allclose(dz, dz_ref, atol=1e-5, rtol=1e-5)

    print("KERNEL_OK")
</pallas_src>

<mosaic_0001>
module attributes {stable_mosaic.version = 11 : i64} {
  func.func @flow1d_kernel(%arg0: i32, %arg1: memref<4xf32, #tpu.memory_space<smem>>, %arg2: memref<4xf32, #tpu.memory_space<smem>>, %arg3: memref<4xf32, #tpu.memory_space<smem>>, %arg4: memref<4xf32, #tpu.memory_space<smem>>, %arg5: memref<16x128xf32, #tpu.memory_space<vmem>>, %arg6: memref<16x128xf32, #tpu.memory_space<vmem>>, %arg7: memref<16x128xf32, #tpu.memory_space<vmem>>) attributes {dimension_semantics = [#tpu.dimension_semantics<parallel>], iteration_bounds = array<i64: 1>, scalar_prefetch = 4 : i64, scratch_operands = 0 : i64, tpu.core_type = #tpu.core_type<tc>, window_params = [{transform_indices = @transform_0, window_bounds = array<i64: 16, 128>}, {transform_indices = @transform_1, window_bounds = array<i64: 16, 128>}, {transform_indices = @transform_2, window_bounds = array<i64: 16, 128>}]} {
    %c0 = arith.constant 0 : index
    %c0_0 = arith.constant 0 : index
    %0 = vector.load %arg5[%c0, %c0_0] : memref<16x128xf32, #tpu.memory_space<vmem>>, vector<16x128xf32>
    %cst = arith.constant 5.000000e-01 : f32
    %1 = vector.broadcast %cst : f32 to vector<16x128xf32>
    %cst_1 = arith.constant 0.000000e+00 : f32
    %2 = vector.broadcast %cst_1 : f32 to vector<16x128xf32>
    %c0_2 = arith.constant 0 : index
    %3 = memref.load %arg1[%c0_2] : memref<4xf32, #tpu.memory_space<smem>>
    %c0_3 = arith.constant 0 : index
    %4 = memref.load %arg2[%c0_3] : memref<4xf32, #tpu.memory_space<smem>>
    %c0_4 = arith.constant 0 : index
    %5 = memref.load %arg3[%c0_4] : memref<4xf32, #tpu.memory_space<smem>>
    %c0_5 = arith.constant 0 : index
    %6 = memref.load %arg4[%c0_5] : memref<4xf32, #tpu.memory_space<smem>>
    %7 = vector.broadcast %3 : f32 to vector<16x128xf32>
    %8 = arith.subf %0, %7 : vector<16x128xf32>
    %9 = vector.broadcast %4 : f32 to vector<16x128xf32>
    %10 = arith.mulf %8, %9 : vector<16x128xf32>
    %11 = math.erf %10 : vector<16x128xf32>
    %12 = vector.broadcast %6 : f32 to vector<16x128xf32>
    %13 = arith.mulf %11, %12 : vector<16x128xf32>
    %14 = arith.addf %1, %13 : vector<16x128xf32>
    %15 = arith.mulf %10, %10 : vector<16x128xf32>
    %cst_6 = arith.constant 0.000000e+00 : f32
    %16 = vector.broadcast %cst_6 : f32 to vector<16x128xf32>
    %17 = arith.subf %16, %15 : vector<16x128xf32>
    %18 = math.exp %17 : vector<16x128xf32>
    %19 = vector.broadcast %5 : f32 to vector<16x128xf32>
    %20 = arith.mulf %18, %19 : vector<16x128xf32>
    %21 = arith.addf %2, %20 : vector<16x128xf32>
    %c1 = arith.constant 1 : index
    %22 = memref.load %arg1[%c1] : memref<4xf32, #tpu.memory_space<smem>>
    %c1_7 = arith.constant 1 : index
    %23 = memref.load %arg2[%c1_7] : memref<4xf32, #tpu.memory_space<smem>>
    %c1_8 = arith.constant 1 : index
    %24 = memref.load %arg3[%c1_8] : memref<4xf32, #tpu.memory_space<smem>>
    %c1_9 = arith.constant 1 : index
    %25 = memref.load %arg4[%c1_9] : memref<4xf32, #tpu.memory_space<smem>>
    %26 = vector.broadcast %22 : f32 to vector<16x128xf32>
    %27 = arith.subf %0, %26 : vector<16x128xf32>
    %28 = vector.broadcast %23 : f32 to vector<16x128xf32>
    %29 = arith.mulf %27, %28 : vector<16x128xf32>
    %30 = math.erf %29 : vector<16x128xf32>
    %31 = vector.broadcast %25 : f32 to vector<16x128xf32>
    %32 = arith.mulf %30, %31 : vector<16x128xf32>
    %33 = arith.addf %14, %32 : vector<16x128xf32>
    %34 = arith.mulf %29, %29 : vector<16x128xf32>
    %cst_10 = arith.constant 0.000000e+00 : f32
    %35 = vector.broadcast %cst_10 : f32 to vector<16x128xf32>
    %36 = arith.subf %35, %34 : vector<16x128xf32>
    %37 = math.exp %36 : vector<16x128xf32>
    %38 = vector.broadcast %24 : f32 to vector<16x128xf32>
    %39 = arith.mulf %37, %38 : vector<16x128xf32>
    %40 = arith.addf %21, %39 : vector<16x128xf32>
    %c2 = arith.constant 2 : index
    %41 = memref.load %arg1[%c2] : memref<4xf32, #tpu.memory_space<smem>>
    %c2_11 = arith.constant 2 : index
    %42 = memref.load %arg2[%c2_11] : memref<4xf32, #tpu.memory_space<smem>>
    %c2_12 = arith.constant 2 : index
    %43 = memref.load %arg3[%c2_12] : memref<4xf32, #tpu.memory_space<smem>>
    %c2_13 = arith.constant 2 : index
    %44 = memref.load %arg4[%c2_13] : memref<4xf32, #tpu.memory_space<smem>>
    %45 = vector.broadcast %41 : f32 to vector<16x128xf32>
    %46 = arith.subf %0, %45 : vector<16x128xf32>
    %47 = vector.broadcast %42 : f32 to vector<16x128xf32>
    %48 = arith.mulf %46, %47 : vector<16x128xf32>
    %49 = math.erf %48 : vector<16x128xf32>
    %50 = vector.broadcast %44 : f32 to vector<16x128xf32>
    %51 = arith.mulf %49, %50 : vector<16x128xf32>
    %52 = arith.addf %33, %51 : vector<16x128xf32>
    %53 = arith.mulf %48, %48 : vector<16x128xf32>
    %cst_14 = arith.constant 0.000000e+00 : f32
    %54 = vector.broadcast %cst_14 : f32 to vector<16x128xf32>
    %55 = arith.subf %54, %53 : vector<16x128xf32>
    %56 = math.exp %55 : vector<16x128xf32>
    %57 = vector.broadcast %43 : f32 to vector<16x128xf32>
    %58 = arith.mulf %56, %57 : vector<16x128xf32>
    %59 = arith.addf %40, %58 : vector<16x128xf32>
    %c3 = arith.constant 3 : index
    %60 = memref.load %arg1[%c3] : memref<4xf32, #tpu.memory_space<smem>>
    %c3_15 = arith.constant 3 : index
    %61 = memref.load %arg2[%c3_15] : memref<4xf32, #tpu.memory_space<smem>>
    %c3_16 = arith.constant 3 : index
    %62 = memref.load %arg3[%c3_16] : memref<4xf32, #tpu.memory_space<smem>>
    %c3_17 = arith.constant 3 : index
    %63 = memref.load %arg4[%c3_17] : memref<4xf32, #tpu.memory_space<smem>>
    %64 = vector.broadcast %60 : f32 to vector<16x128xf32>
    %65 = arith.subf %0, %64 : vector<16x128xf32>
    %66 = vector.broadcast %61 : f32 to vector<16x128xf32>
    %67 = arith.mulf %65, %66 : vector<16x128xf32>
    %68 = math.erf %67 : vector<16x128xf32>
    %69 = vector.broadcast %63 : f32 to vector<16x128xf32>
    %70 = arith.mulf %68, %69 : vector<16x128xf32>
    %71 = arith.addf %52, %70 : vector<16x128xf32>
    %72 = arith.mulf %67, %67 : vector<16x128xf32>
    %cst_18 = arith.constant 0.000000e+00 : f32
    %73 = vector.broadcast %cst_18 : f32 to vector<16x128xf32>
    %74 = arith.subf %73, %72 : vector<16x128xf32>
    %75 = math.exp %74 : vector<16x128xf32>
    %76 = vector.broadcast %62 : f32 to vector<16x128xf32>
    %77 = arith.mulf %75, %76 : vector<16x128xf32>
    %78 = arith.addf %59, %77 : vector<16x128xf32>
    %c0_19 = arith.constant 0 : index
    %c0_20 = arith.constant 0 : index
    %79 = vector.load %arg6[%c0_19, %c0_20] : memref<16x128xf32, #tpu.memory_space<vmem>>, vector<16x128xf32>
    tpu.vector_store %arg6[%c0_19, %c0_20], %71 {strides = array<i32>} : memref<16x128xf32, #tpu.memory_space<vmem>>, vector<16x128xf32>,
    %c0_21 = arith.constant 0 : index
    %c0_22 = arith.constant 0 : index
    %80 = vector.load %arg7[%c0_21, %c0_22] : memref<16x128xf32, #tpu.memory_space<vmem>>, vector<16x128xf32>
    tpu.vector_store %arg7[%c0_21, %c0_22], %78 {strides = array<i32>} : memref<16x128xf32, #tpu.memory_space<vmem>>, vector<16x128xf32>,
    return
  }
  func.func @transform_0(%arg0: i32, %arg1: memref<4xf32, #tpu.memory_space<smem>>, %arg2: memref<4xf32, #tpu.memory_space<smem>>, %arg3: memref<4xf32, #tpu.memory_space<smem>>, %arg4: memref<4xf32, #tpu.memory_space<smem>>) -> (i32, i32) {
    %c0_i32 = arith.constant 0 : i32
    %c0_i32_0 = arith.constant 0 : i32
    return %arg0, %c0_i32 : i32, i32
  }
  func.func @transform_1(%arg0: i32, %arg1: memref<4xf32, #tpu.memory_space<smem>>, %arg2: memref<4xf32, #tpu.memory_space<smem>>, %arg3: memref<4xf32, #tpu.memory_space<smem>>, %arg4: memref<4xf32, #tpu.memory_space<smem>>) -> (i32, i32) {
    %c0_i32 = arith.constant 0 : i32
    %c0_i32_0 = arith.constant 0 : i32
    return %arg0, %c0_i32 : i32, i32
  }
  func.func @transform_2(%arg0: i32, %arg1: memref<4xf32, #tpu.memory_space<smem>>, %arg2: memref<4xf32, #tpu.memory_space<smem>>, %arg3: memref<4xf32, #tpu.memory_space<smem>>, %arg4: memref<4xf32, #tpu.memory_space<smem>>) -> (i32, i32) {
    %c0_i32 = arith.constant 0 : i32
    %c0_i32_0 = arith.constant 0 : i32
    return %arg0, %c0_i32 : i32, i32
  }
}

</mosaic_0001>

<bundles_post_ra>
// kernel: tpu_custom_call.1
= control target key start
LH: loop header
LB: loop body
LE: loop exit
PB: predicated region body
PF: predicated region fallthrough
CT: control target
= control target key end

     0   :  { %s524_s0 = inlined_call_operand.hbm [shape: f32[4], index: 0, kind: input, shape index: {}]   ;;  %s525_s4 = inlined_call_operand.hbm [shape: f32[16,128], index: 4, kind: input, shape index: {}]   ;;  %s526_s5 = inlined_call_operand.hbm [shape: f32[16,128], index: 5, kind: output, shape index: {0}]   ;;  %s527_s6 = inlined_call_operand.hbm [shape: f32[16,128], index: 6, kind: output, shape index: {1}]   ;;  %s528_s1 = inlined_call_operand.vmem [shape: f32[4], index: 1, kind: input, shape index: {}]   ;;  %s529_s2 = inlined_call_operand.vmem [shape: f32[4], index: 2, kind: input, shape index: {}]   ;;  %s530_s3 = inlined_call_operand.vmem [shape: f32[4], index: 3, kind: input, shape index: {}]  }
   0x1   :  { %s258_s23 = scalar_lea.hbm %s524_s0, 16 }
   0x2   :  { %p259_p0 = scmp.ne.s32.totalorder %s524_s0, %s258_s23  ;;  %p262_p1 = scmp.lt.u32.totalorder %s258_s23, %s524_s0 }
   0x4   :  { %p264_p2 = pnand %p262_p1, %p259_p0 }
   0x6   :  { %267 = shalt.err (!%p264_p2)  }
   0x7   :  { %s378_s28 = smov [#allocation3]   ;;  %s14_s9 = sshll.u32 %s528_s1, 4  ;;  %s15_s9 = int_to_ptr.vmem [resolvable:$true] %s14_s9 }
   0x8   :  { %13 = dma.hbm_to_smem %s524_s0, 16, %s378_s28, [#allocation2] }
   0x9   :  { %s18_s12 = sshll.u32 %s529_s2, 4  ;;  %s268_s13 = scalar_lea.vmem %s15_s9, 16  ;;  %s19_s12 = int_to_ptr.vmem [resolvable:$true] %s18_s12 }
   0xa   :  { %p269_p3 = scmp.ne.s32.totalorder %s15_s9, %s268_s13  ;;  %p273_p4 = scmp.lt.s32.totalorder %s15_s9, %s15_s9 }
   0xb   :  { %p274_p5 = scmp.lt.s32.totalorder %s268_s13, %s268_s13 }
   0xd   :  { %p275_p6 = por %p274_p5, %p273_p4 }
   0xf   :  { %p276_p7 = pnand %p275_p6, %p269_p3 }
  0x11   :  { %279 = shalt.err (!%p276_p7)  }
  0x12   :  { %s379_s14 = smov [#allocation4]   ;;  %s22_s16 = sshll.u32 %s530_s3, 4  ;;  %s23_s16 = int_to_ptr.vmem [resolvable:$true] %s22_s16 }
  0x13   :  { %17 = dma.vmem_to_smem %s15_s9, 16, %s379_s14, [#allocation2] }
  0x14   :  { %s280_s1 = scalar_lea.vmem %s19_s12, 16  ;;  %p285_p9 = scmp.lt.s32.totalorder %s19_s12, %s19_s12 }
  0x15   :  { %p281_p8 = scmp.ne.s32.totalorder %s19_s12, %s280_s1  ;;  %p286_p10 = scmp.lt.s32.totalorder %s280_s1, %s280_s1 }
  0x17   :  { %p287_p11 = por %p286_p10, %p285_p9 }
  0x19   :  { %p288_p12 = pnand %p287_p11, %p281_p8 }
  0x1b   :  { %291 = shalt.err (!%p288_p12)  }
  0x1c   :  { %s380_s2 = smov [#allocation5]   ;;  %s292_s17 = scalar_lea.vmem %s23_s16, 16 }
  0x1d   :  { %21 = dma.vmem_to_smem %s19_s12, 16, %s380_s2, [#allocation2] }
  0x1e   :  { %p293_p13 = scmp.ne.s32.totalorder %s23_s16, %s292_s17  ;;  %p297_p0 = scmp.lt.s32.totalorder %s23_s16, %s23_s16 }
  0x1f   :  { %p298_p1 = scmp.lt.s32.totalorder %s292_s17, %s292_s17 }
  0x21   :  { %p299_p2 = por %p298_p1, %p297_p0 }
  0x23   :  { %p300_p3 = pnand %p299_p2, %p293_p13 }
  0x25   :  { %303 = shalt.err (!%p300_p3)  }
  0x26   :  { %s381_s18 = smov [#allocation6]  }
  0x27   :  { %25 = dma.vmem_to_smem %s23_s16, 16, %s381_s18, [#allocation2] }
  0x28   :  { %370 = dma.done.wait [#allocation2], 64 }
  0x29   :  { %371 = vsyncadd [#allocation2], 4294967232 }
  0x2a   :  { %27 = sfence }
  0x2b   :  { %28 = vsyncpa [#allocation8], 0 }
  0x2c   :  { %29 = vsyncpa [#allocation9], 0 }
  0x2d   :  { %30 = vsyncpa [#allocation12], 0  ;;  %s382_s3 = smov [#allocation7]   ;;  %s304_s22 = scalar_lea.hbm %s525_s4, 256 }
  0x2e   :  { %s36_s19 = sshll.u32 %s382_s3, 4  ;;  %p305_p4 = scmp.ne.s32.totalorder %s525_s4, %s304_s22  ;;  %s37_s19 = int_to_ptr.vmem [resolvable:$true] %s36_s19 }
  0x2f   :  { %p308_p5 = scmp.lt.u32.totalorder %s304_s22, %s525_s4 }
  0x31   :  { %p310_p6 = pnand %p308_p5, %p305_p4 }
  0x33   :  { %313 = shalt.err (!%p310_p6)
}
  0x34   :  { %s314_s27 = scalar_lea.vmem %s37_s19, 256  ;;  %p319_p8 = scmp.lt.s32.totalorder %s37_s19, %s37_s19 }
  0x35   :  { %p315_p7 = scmp.ne.s32.totalorder %s37_s19, %s314_s27  ;;  %p320_p9 = scmp.lt.s32.totalorder %s314_s27, %s314_s27 }
  0x37   :  { %p321_p10 = por %p320_p9, %p319_p8 }
  0x39   :  { %p322_p11 = pnand %p321_p10, %p315_p7 }
  0x3b   :  { %325 = shalt.err (!%p322_p11)
}
  0x3c   :  { %s383_s28 = smov 128   ;;  %s384_s29 = smov 8  }
  0x3d   :  { %42 = dma.hbm_to_vmem [thread:$0]  %s525_s4, 256, %s37_s19, [#allocation8], %s383_s28, %s383_s28, %s384_s29  }
  0x3e   :  { %372 = dma.done.wait [#allocation8], 256  }
  0x3f   :  { %373 = vsyncadd [#allocation8], 4294967040  ;;  %s48_s8 = sld [smem:[#allocation3]]  ;;  %s205_s10 = sld [smem:[#allocation3 + $0x1]]  ;;  %v46_v0 = vld [vmem:[#allocation7] sm:$0xff]  ;;  %v47_v3 = vld [vmem:[#allocation7 + $0x8] sm:$0xff] }
  0x40   :  { %s49_s9 = sld [smem:[#allocation4]]  ;;  %s458_s11 = sld [smem:[#allocation4 + $0x1]] }
  0x41   :  { %s209_s12 = sld [smem:[#allocation3 + $0x2]]  ;;  %s462_s14 = sld [smem:[#allocation3 + $0x3]] }
  0x42   :  { %s460_s13 = sld [smem:[#allocation4 + $0x2]]  ;;  %s464_s0 = sld [smem:[#allocation4 + $0x3]] }
  0x43   :  { %s466_s15 = sld [smem:[#allocation6]]  ;;  %s468_s4 = sld [smem:[#allocation6 + $0x1]] }
  0x44   :  { %s471_s16 = sld [smem:[#allocation6 + $0x2]]  ;;  %s476_s1 = sld [smem:[#allocation6 + $0x3]] }
  0x45   :  { %v52_v1 = vstv %s48_s8  ;;  %v82_v5 = vstv %s205_s10  ;;  %s481_s2 = sld [smem:[#allocation5]]  ;;  %s483_s17 = sld [smem:[#allocation5 + $0x1]] }
  0x46   :  { %v55_v2 = vstv %s49_s9  ;;  %v53_v4 = vsub.f32 %v46_v0, %v52_v1  ;;  %v54_v6 = vsub.f32 %v47_v3, %v52_v1  ;;  %v83_v7 = vsub.f32 %v46_v0, %v82_v5  ;;  %s486_s18 = sld [smem:[#allocation5 + $0x2]]  ;;  %s488_s3 = sld [smem:[#allocation5 + $0x3]] }
  0x47   :  { %v85_v8 = vstv %s458_s11  ;;  %v112_v10 = vstv %s209_s12  ;;  %v142_v14 = vstv %s462_s14  ;;  %v84_v15 = vsub.f32 %v47_v3, %v82_v5  ;;  %s385_s19 = smov [#allocation10]  }
  0x48   :  { %v56_v9 = vmul.f32 %v55_v2, %v53_v4  ;;  %v115_v11 = vstv %s460_s13  ;;  %v86_v12 = vmul.f32 %v85_v8, %v83_v7  ;;  %v113_v13 = vsub.f32 %v46_v0, %v112_v10  ;;  %s177_s20 = sshll.u32 %s385_s19, 4  ;;  %s178_s20 = int_to_ptr.vmem [resolvable:$true] %s177_s20 }
  0x49   :  { %v143_v16 = vsub.f32 %v46_v0, %v142_v14  ;;  %v145_v17 = vstv %s464_s0  ;;  %v57_v18 = vmul.f32 %v55_v2, %v54_v6  ;;  %v114_v20 = vsub.f32 %v47_v3, %v112_v10  ;;  %s326_s21 = scalar_lea.vmem %s178_s20, 256  ;;  %p331_p13 = scmp.lt.s32.totalorder %s178_s20, %s178_s20 }
  0x4a   :  { %226 = verf.f32 %v56_v9  ;;  %v116_v19 = vmul.f32 %v115_v11, %v113_v13  ;;  %v144_v22 = vsub.f32 %v47_v3, %v142_v14  ;;  %v65_v23 = vmul.f32 %v56_v9, %v56_v9  ;;  %p327_p12 = scmp.ne.s32.totalorder %s178_s20, %s326_s21  ;;  %p332_p0 = scmp.lt.s32.totalorder %s326_s21, %s326_s21 }
  0x4b   :  { %228 = verf.f32 %v86_v12  ;;  %v146_v21 = vmul.f32 %v145_v17, %v143_v16  ;;  %v60_v24 = vstv %s466_s15  ;;  %v87_v25 = vmul.f32 %v85_v8, %v84_v15 }
  0x4c   :  { %230 = verf.f32 %v57_v18  ;;  %v95_v26 = vmul.f32 %v86_v12, %v86_v12  ;;  %v90_v27 = vstv %s468_s4  ;;  %v117_v28 = vmul.f32 %v115_v11, %v114_v20  ;;  %p333_p1 = por %p332_p0, %p331_p13 }
  0x4d   :  { %232 = verf.f32 %v116_v19  ;;  %v67_v29 = vsub.f32 0.0, %v65_v23  ;;  %v147_v30 = vmul.f32 %v145_v17, %v144_v22  ;;  %v125_v32 = vmul.f32 %v116_v19, %v116_v19 }
  0x4e   :  { %234 = verf.f32 %v146_v21  ;;  %v97_v31 = vsub.f32 0.0, %v95_v26  ;;  %v120_v33 = vstv %s471_s16  ;;  %v155_v35 = vmul.f32 %v146_v21, %v146_v21  ;;  %p334_p2 = pnand %p333_p1, %p327_p12 }
  0x4f   :  { %236 = verf.f32 %v87_v25  ;;  %v69_v34 = vmul.f32 1.442695, %v67_v29  ;;  %v127_v37 = vsub.f32 0.0, %v125_v32  ;;  %v66_v38 = vmul.f32 %v57_v18, %v57_v18 }
  0x50   :  { %238 = verf.f32 %v117_v28  ;;  %v99_v36 = vmul.f32 1.442695, %v97_v31  ;;  %v157_v39 = vsub.f32 0.0, %v155_v35  ;;  %v96_v40 = vmul.f32 %v87_v25, %v87_v25 }
  0x51   :  { %240 = verf.f32 %v147_v30  ;;  %v126_v41 = vmul.f32 %v117_v28, %v117_v28  ;;  %v129_v42 = vmul.f32 1.442695, %v127_v37  ;;  %v68_v43 = vsub.f32 0.0, %v66_v38 }
  0x52   :  { %242 = vpow2.f32 %v69_v34  ;;  %v156_v44 = vmul.f32 %v147_v30, %v147_v30  ;;  %v150_v46 = vstv %s476_s1  ;;  %v159_v47 = vmul.f32 1.442695, %v157_v39 }
  0x53   :  { %244 = vpow2.f32 %v99_v36  ;;  %v98_v48 = vsub.f32 0.0, %v96_v40  ;;  %v128_v49 = vsub.f32 0.0, %v126_v41  ;;  %v71_v52 = vmul.f32 1.442695, %v68_v43 }
  0x54   :  { %v227_v45 = vpop.eup %226  ;;  %246 = vpow2.f32 %v129_v42  ;;  %v158_v53 = vsub.f32 0.0, %v156_v44  ;;  %v73_v6 = vstv %s481_s2  ;;  %v103_v10 = vstv %s483_s17 }
  0x55   :  { %v229_v50 = vpop.eup %228  ;;  %v61_v51 = vmul.f32 %v227_v45, %v60_v24  ;;  %248 = vpow2.f32 %v159_v47  ;;  %v101_v56 = vmul.f32 1.442695, %v98_v48  ;;  %v131_v57 = vmul.f32 1.442695, %v128_v49 }
  0x56   :  { %v231_v54 = vpop.eup %230  ;;  %v91_v55 = vmul.f32 %v229_v50, %v90_v27  ;;  %250 = vpow2.f32 %v71_v52  ;;  %v161_v61 = vmul.f32 1.442695, %v158_v53  ;;  %v133_v17 = vstv %s486_s18 }
  0x57   :  { %v233_v58 = vpop.eup %232  ;;  %v63_v59 = vadd.f32 0.5, %v61_v51  ;;  %v62_v60 = vmul.f32 %v231_v54, %v60_v24  ;;  %252 = vpow2.f32 %v101_v56  ;;  %v163_v20 = vstv %s488_s3 }
  0x58   :  { %v235_v62 = vpop.eup %234  ;;  %v121_v63 = vmul.f32 %v233_v58, %v120_v33  ;;  %254 = vpow2.f32 %v131_v57 }
  0x59   :  { %v237_v0 = vpop.eup %236  ;;  %v93_v1 = vadd.f32 %v91_v55, %v63_v59  ;;  %v151_v2 = vmul.f32 %v235_v62, %v150_v46  ;;  %v64_v3 = vadd.f32 0.5, %v62_v60  ;;  %256 = vpow2.f32 %v161_v61 }
  0x5a   :  { %v239_v4 = vpop.eup %238  ;;  %v92_v5 = vmul.f32 %v237_v0, %v90_v27 }
  0x5b   :  { %v241_v7 = vpop.eup %240  ;;  %v123_v8 = vadd.f32 %v121_v63, %v93_v1  ;;  %v122_v9 = vmul.f32 %v239_v4, %v120_v33 }
  0x5c   :  { %v243_v11 = vpop.eup %242  ;;  %v94_v12 = vadd.f32 %v92_v5, %v64_v3  ;;  %v152_v13 = vmul.f32 %v241_v7, %v150_v46 }
  0x5d   :  { %v245_v14 = vpop.eup %244  ;;  %v153_v15 = vadd.f32 %v151_v2, %v123_v8  ;;  %v74_v16 = vmul.f32 %v243_v11, %v73_v6 }
  0x5e   :  { %v124_v18 = vadd.f32 %v122_v9, %v94_v12  ;;  %v104_v19 = vmul.f32 %v245_v14, %v103_v10  ;;  %v247_v21 = vpop.eup %246 }
  0x5f   :  { %168 = vst [vmem:[#allocation10] sm:$0xff] %v153_v15  ;;  %v249_v22 = vpop.eup %248  ;;  %v134_v25 = vmul.f32 %v247_v21, %v133_v17 }
  0x60   :  { %v154_v23 = vadd.f32 %v152_v13, %v124_v18  ;;  %v106_v24 = vadd.f32 %v104_v19, %v74_v16  ;;  %v251_v26 = vpop.eup %250  ;;  %v164_v27 = vmul.f32 %v249_v22, %v163_v20 }
  0x61   :  { %v253_v28 = vpop.eup %252  ;;  %v75_v30 = vmul.f32 %v251_v26, %v73_v6 }
  0x62   :  { %169 = vst [vmem:[#allocation10 + $0x8] sm:$0xff] %v154_v23  ;;  %v136_v29 = vadd.f32 %v134_v25, %v106_v24  ;;  %v255_v31 = vpop.eup %254  ;;  %v105_v32 = vmul.f32 %v253_v28, %v103_v10 }
  0x63   :  { %337 = shalt.err (!%p334_p2)
}
  0x64   :  { %s338_s24 = scalar_lea.hbm %s526_s5, 256 }
  0x65   :  { %p339_p3 = scmp.ne.s32.totalorder %s526_s5, %s338_s24  ;;  %p342_p4 = scmp.lt.u32.totalorder %s338_s24, %s526_s5 }
  0x67   :  { %p344_p5 = pnand %p342_p4, %p339_p3 }
  0x69   :  { %347 = shalt.err (!%p344_p5)
}
  0x6a   :  { %183 = dma.vmem_to_hbm [thread:$0]  %s178_s20, 256, %s526_s5, [#allocation9], %s383_s28, %s383_s28, %s384_s29   ;;  %v257_v33 = vpop.eup %256  ;;  %v166_v34 = vadd.f32 %v164_v27, %v136_v29  ;;  %v135_v35 = vmul.f32 %v255_v31, %v133_v17  ;;  %v107_v36 = vadd.f32 %v105_v32, %v75_v30 }
  0x6b   :  { %v165_v37 = vmul.f32 %v257_v33, %v163_v20  ;;  %s386_s9 = smov [#allocation11]  }
  0x6c   :  { %170 = vst [vmem:[#allocation11] sm:$0xff] %v166_v34  ;;  %s189_s10 = sshll.u32 %s386_s9, 4  ;;  %v137_v38 = vadd.f32 %v135_v35, %v107_v36  ;;  %s190_s10 = int_to_ptr.vmem [resolvable:$true] %s189_s10 }
  0x6d   :  { %s348_s11 = scalar_lea.vmem %s190_s10, 256  ;;  %p353_p7 = scmp.lt.s32.totalorder %s190_s10, %s190_s10 }
  0x6e   :  { %v167_v39 = vadd.f32 %v165_v37, %v137_v38  ;;  %p349_p6 = scmp.ne.s32.totalorder %s190_s10, %s348_s11  ;;  %p354_p8 = scmp.lt.s32.totalorder %s348_s11, %s348_s11 }
  0x70   :  { %171 = vst [vmem:[#allocation11 + $0x8] sm:$0xff] %v167_v39  ;;  %p355_p9 = por %p354_p8, %p353_p7 }
  0x72   :  { %p356_p10 = pnand %p355_p9, %p349_p6 }
  0x74   :  { %359 = shalt.err (!%p356_p10)
}
  0x75   :  { %s360_s13 = scalar_lea.hbm %s527_s6, 256 }
  0x76   :  { %p361_p11 = scmp.ne.s32.totalorder %s527_s6, %s360_s13  ;;  %p364_p12 = scmp.lt.u32.totalorder %s360_s13, %s527_s6 }
  0x78   :  { %p366_p13 = pnand %p364_p12, %p361_p11 }
  0x7a   :  { %369 = shalt.err (!%p366_p13)
}
  0x7b   :  { %195 = dma.vmem_to_hbm [thread:$0]  %s190_s10, 256, %s527_s6, [#allocation12], %s383_s28, %s383_s28, %s384_s29  }
  0x7c   :  { %374 = dma.done.wait [#allocation9], 256  }
  0x7d   :  { %375 = vsyncadd [#allocation9], 4294967040 }
  0x7e   :  { %376 = dma.done.wait [#allocation12], 256  }
  0x7f   :  { %377 = vsyncadd [#allocation12], 4294967040 }
  0x80   :  { %202 = vsyncpa [#allocation8], 1 }
  0x81   :  { %203 = vsyncpa [#allocation9], 1 }
  0x82   :  { %204 = vsyncpa [#allocation12], 1 }

</bundles_post_ra>
